<compile_context>
chip_gen: v7x
topology: tpu7x:2x2x1
jax: 0.10.0
libtpu: 0.0.40
codegen_flags: <defaults>
</compile_context>

<pallas_src>
import numpy as np

import jax
import jax.numpy as jnp
from jax.experimental import pallas as pl
from jax.experimental.pallas import tpu as pltpu

SLOWFAST_ALPHA = 4


def _make_slow_gather_kernel(t_slow: int, nbuf: int):
    """HBM->HBM gather: copy frame idx_ref[t] into slow-pathway slot t."""

    def kernel(idx_ref, frames_hbm, slow_hbm, sems):
        # idx_ref:    (t_slow,) int32 in SMEM (scalar prefetch)
        # frames_hbm: (B, C, T, H*W) ref in HBM (memory_space=pl.ANY)
        # slow_hbm:   (B, C, t_slow, H*W) ref in HBM (memory_space=pl.ANY)
        # sems:       (nbuf,) DMA semaphores
        def dma(t, slot):
            return pltpu.make_async_copy(
                frames_hbm.at[:, :, pl.ds(idx_ref[t], 1), :],
                slow_hbm.at[:, :, pl.ds(t, 1), :],
                sems.at[slot],
            )

        # Prime: keep up to `nbuf` copies in flight.
        for t in range(min(nbuf, t_slow)):
            dma(t, t % nbuf).start()
        # Sliding window: wait for copy t, immediately refill the slot.
        for t in range(t_slow):
            dma(t, t % nbuf).wait()
            nxt = t + nbuf
            if nxt < t_slow:
                dma(nxt, nxt % nbuf).start()

    return kernel


def pack_pathway(frames: jax.Array):
    """Returns [slow_pathway, fast_pathway], matching PackPathway.forward."""
    B, C, T, H, W = frames.shape
    t_slow = T // SLOWFAST_ALPHA

    if t_slow == 0:
        # Degenerate case (T < alpha): empty slow pathway, like an empty
        # torch.index_select result.
        slow = jnp.zeros((B, C, 0, H, W), dtype=frames.dtype)
        return [slow, frames]

    # Index table computed host-side with integer arithmetic (matches
    # torch.linspace(0, T-1, t_slow).long() truncation without float-rounding
    # surprises).
    if t_slow == 1:
        idx_np = np.zeros((1,), dtype=np.int32)
    else:
        idx_np = np.array(
            [(i * (T - 1)) // (t_slow - 1) for i in range(t_slow)],
            dtype=np.int32,
        )
    idx = jnp.asarray(idx_np)

    # Free reshape: flatten spatial dims so each DMA moves a dense H*W slab.
    frames_flat = frames.reshape(B, C, T, H * W)

    nbuf = max(1, min(t_slow, 8))  # copies in flight
    slow_bytes = B * C * t_slow * H * W * frames.dtype.itemsize

    slow_flat = pl.pallas_call(
        _make_slow_gather_kernel(t_slow, nbuf),
        out_shape=jax.ShapeDtypeStruct((B, C, t_slow, H * W), frames.dtype),
        grid_spec=pltpu.PrefetchScalarGridSpec(
            num_scalar_prefetch=1,
            grid=(1,),
            in_specs=[pl.BlockSpec(memory_space=pl.ANY)],   # frames stay in HBM
            out_specs=pl.BlockSpec(memory_space=pl.ANY),    # slow written via DMA
            scratch_shapes=[pltpu.SemaphoreType.DMA((nbuf,))],
        ),
        compiler_params=pltpu.CompilerParams(
            dimension_semantics=("arbitrary",)),
        cost_estimate=pl.CostEstimate(
            flops=0, transcendentals=0, bytes_accessed=2 * slow_bytes),
    )(idx, frames_flat)

    slow = slow_flat.reshape(B, C, t_slow, H, W)

    # Fast pathway is the identity — no compute, so no kernel needed.
    fast = frames
    return [slow, fast]


if __name__ == "__main__":
    key = jax.random.PRNGKey(0)
    # Small shapes consistent with the module: (B, C, T, H, W)
    frames = jax.random.normal(key, (2, 4, 8, 16, 16), dtype=jnp.float32)

    slow, fast = pack_pathway(frames)
    slow = jax.block_until_ready(slow)
    fast = jax.block_until_ready(fast)

    # Reference check against plain-JAX semantics of torch.index_select with
    # torch.linspace(0, T-1, T // alpha).long() indices.
    T = frames.shape[2]
    t_slow = T // SLOWFAST_ALPHA
    ref_idx = jnp.linspace(0.0, float(T - 1), t_slow).astype(jnp.int32)
    slow_ref = jnp.take(frames, ref_idx, axis=2)

    assert slow.shape == (2, 4, t_slow, 16, 16), slow.shape
    assert fast.shape == frames.shape, fast.shape
    assert jnp.array_equal(slow, slow_ref), "slow pathway mismatch"
    assert jnp.array_equal(fast, frames), "fast pathway mismatch"

    print("KERNEL_OK")
</pallas_src>

<mosaic_0001>
module attributes {stable_mosaic.version = 11 : i64} {
  func.func @kernel(%arg0: i32, %arg1: memref<2xi32, #tpu.memory_space<smem>>, %arg2: memref<2x4x8x256xf32, #tpu.memory_space<any>>, %arg3: memref<2x4x2x256xf32, #tpu.memory_space<any>>, %arg4: memref<2x!tpu.dma_semaphore, #tpu.memory_space<semaphore_mem>>) attributes {dimension_semantics = [#tpu.dimension_semantics<arbitrary>], iteration_bounds = array<i64: 1>, scalar_prefetch = 1 : i64, scratch_operands = 1 : i64, tpu.core_type = #tpu.core_type<tc>, window_params = [{}, {}]} {
    %c0 = arith.constant 0 : index
    %0 = memref.load %arg1[%c0] : memref<2xi32, #tpu.memory_space<smem>>
    %c0_i32 = arith.constant 0 : i32
    %c0_i32_0 = arith.constant 0 : i32
    %c0_i32_1 = arith.constant 0 : i32
    %c0_i32_2 = arith.constant 0 : i32
    %1 = tpu.memref_slice %arg2[%c0_i32_0, %c0_i32_1, %0, %c0_i32_2] : memref<2x4x8x256xf32, #tpu.memory_space<any>> -> memref<2x4x1x256xf32, #tpu.memory_space<any>>
    %c0_i32_3 = arith.constant 0 : i32
    %c0_i32_4 = arith.constant 0 : i32
    %c0_i32_5 = arith.constant 0 : i32
    %c0_i32_6 = arith.constant 0 : i32
    %2 = tpu.memref_slice %arg3[%c0_i32_3, %c0_i32_4, %c0_i32_5, %c0_i32_6] : memref<2x4x2x256xf32, #tpu.memory_space<any>> -> memref<2x4x1x256xf32, #tpu.memory_space<any>>
    %3 = tpu.memref_slice %arg4[%c0_i32] : memref<2x!tpu.dma_semaphore, #tpu.memory_space<semaphore_mem>> -> memref<1x!tpu.dma_semaphore, #tpu.memory_space<semaphore_mem>>
    %4 = tpu.memref_squeeze %3 : memref<1x!tpu.dma_semaphore, #tpu.memory_space<semaphore_mem>> -> memref<!tpu.dma_semaphore, #tpu.memory_space<semaphore_mem>>
    tpu.enqueue_dma source(%1 : memref<2x4x1x256xf32, #tpu.memory_space<any>>) target(%2 : memref<2x4x1x256xf32, #tpu.memory_space<any>>) target_semaphore(%4 : memref<!tpu.dma_semaphore, #tpu.memory_space<semaphore_mem>>)
    %c1 = arith.constant 1 : index
    %5 = memref.load %arg1[%c1] : memref<2xi32, #tpu.memory_space<smem>>
    %c1_i32 = arith.constant 1 : i32
    %c0_i32_7 = arith.constant 0 : i32
    %c0_i32_8 = arith.constant 0 : i32
    %c0_i32_9 = arith.constant 0 : i32
    %6 = tpu.memref_slice %arg2[%c0_i32_7, %c0_i32_8, %5, %c0_i32_9] : memref<2x4x8x256xf32, #tpu.memory_space<any>> -> memref<2x4x1x256xf32, #tpu.memory_space<any>>
    %c0_i32_10 = arith.constant 0 : i32
    %c0_i32_11 = arith.constant 0 : i32
    %c1_i32_12 = arith.constant 1 : i32
    %c0_i32_13 = arith.constant 0 : i32
    %7 = tpu.memref_slice %arg3[%c0_i32_10, %c0_i32_11, %c1_i32_12, %c0_i32_13] : memref<2x4x2x256xf32, #tpu.memory_space<any>> -> memref<2x4x1x256xf32, #tpu.memory_space<any>>
    %8 = tpu.memref_slice %arg4[%c1_i32] : memref<2x!tpu.dma_semaphore, #tpu.memory_space<semaphore_mem>> -> memref<1x!tpu.dma_semaphore, #tpu.memory_space<semaphore_mem>>
    %9 = tpu.memref_squeeze %8 : memref<1x!tpu.dma_semaphore, #tpu.memory_space<semaphore_mem>> -> memref<!tpu.dma_semaphore, #tpu.memory_space<semaphore_mem>>
    tpu.enqueue_dma source(%6 : memref<2x4x1x256xf32, #tpu.memory_space<any>>) target(%7 : memref<2x4x1x256xf32, #tpu.memory_space<any>>) target_semaphore(%9 : memref<!tpu.dma_semaphore, #tpu.memory_space<semaphore_mem>>)
    %c0_14 = arith.constant 0 : index
    %10 = memref.load %arg1[%c0_14] : memref<2xi32, #tpu.memory_space<smem>>
    %c0_i32_15 = arith.constant 0 : i32
    %c0_i32_16 = arith.constant 0 : i32
    %c0_i32_17 = arith.constant 0 : i32
    %c0_i32_18 = arith.constant 0 : i32
    %11 = tpu.memref_slice %arg2[%c0_i32_16, %c0_i32_17, %10, %c0_i32_18] : memref<2x4x8x256xf32, #tpu.memory_space<any>> -> memref<2x4x1x256xf32, #tpu.memory_space<any>>
    %c0_i32_19 = arith.constant 0 : i32
    %c0_i32_20 = arith.constant 0 : i32
    %c0_i32_21 = arith.constant 0 : i32
    %c0_i32_22 = arith.constant 0 : i32
    %12 = tpu.memref_slice %arg3[%c0_i32_19, %c0_i32_20, %c0_i32_21, %c0_i32_22] : memref<2x4x2x256xf32, #tpu.memory_space<any>> -> memref<2x4x1x256xf32, #tpu.memory_space<any>>
    %13 = tpu.memref_slice %arg4[%c0_i32_15] : memref<2x!tpu.dma_semaphore, #tpu.memory_space<semaphore_mem>> -> memref<1x!tpu.dma_semaphore, #tpu.memory_space<semaphore_mem>>
    %14 = tpu.memref_squeeze %13 : memref<1x!tpu.dma_semaphore, #tpu.memory_space<semaphore_mem>> -> memref<!tpu.dma_semaphore, #tpu.memory_space<semaphore_mem>>
    tpu.wait_dma2 semaphore(%14 : memref<!tpu.dma_semaphore, #tpu.memory_space<semaphore_mem>>) src(%11 : memref<2x4x1x256xf32, #tpu.memory_space<any>>) dst(%12 : memref<2x4x1x256xf32, #tpu.memory_space<any>>)
    %c1_23 = arith.constant 1 : index
    %15 = memref.load %arg1[%c1_23] : memref<2xi32, #tpu.memory_space<smem>>
    %c1_i32_24 = arith.constant 1 : i32
    %c0_i32_25 = arith.constant 0 : i32
    %c0_i32_26 = arith.constant 0 : i32
    %c0_i32_27 = arith.constant 0 : i32
    %16 = tpu.memref_slice %arg2[%c0_i32_25, %c0_i32_26, %15, %c0_i32_27] : memref<2x4x8x256xf32, #tpu.memory_space<any>> -> memref<2x4x1x256xf32, #tpu.memory_space<any>>
    %c0_i32_28 = arith.constant 0 : i32
    %c0_i32_29 = arith.constant 0 : i32
    %c1_i32_30 = arith.constant 1 : i32
    %c0_i32_31 = arith.constant 0 : i32
    %17 = tpu.memref_slice %arg3[%c0_i32_28, %c0_i32_29, %c1_i32_30, %c0_i32_31] : memref<2x4x2x256xf32, #tpu.memory_space<any>> -> memref<2x4x1x256xf32, #tpu.memory_space<any>>
    %18 = tpu.memref_slice %arg4[%c1_i32_24] : memref<2x!tpu.dma_semaphore, #tpu.memory_space<semaphore_mem>> -> memref<1x!tpu.dma_semaphore, #tpu.memory_space<semaphore_mem>>
    %19 = tpu.memref_squeeze %18 : memref<1x!tpu.dma_semaphore, #tpu.memory_space<semaphore_mem>> -> memref<!tpu.dma_semaphore, #tpu.memory_space<semaphore_mem>>
    tpu.wait_dma2 semaphore(%19 : memref<!tpu.dma_semaphore, #tpu.memory_space<semaphore_mem>>) src(%16 : memref<2x4x1x256xf32, #tpu.memory_space<any>>) dst(%17 : memref<2x4x1x256xf32, #tpu.memory_space<any>>)
    return
  }
}

</mosaic_0001>

<bundles_post_ra>
// kernel: tpu_custom_call.1
= control target key start
LH: loop header
LB: loop body
LE: loop exit
PB: predicated region body
PF: predicated region fallthrough
CT: control target
= control target key end

     0   :  { %s175_s0 = inlined_call_operand.hbm [shape: s32[2], index: 0, kind: input, shape index: {}]   ;;  %s176_s1 = inlined_call_operand.hbm [shape: f32[2,4,8,256], index: 1, kind: input, shape index: {}]   ;;  %s177_s2 = inlined_call_operand.hbm [shape: f32[2,4,2,256], index: 2, kind: output, shape index: {}]  }
   0x1   :  { %s111_s11 = scalar_lea.hbm %s175_s0, 16 }
   0x2   :  { %p112_p0 = scmp.ne.s32.totalorder %s175_s0, %s111_s11  ;;  %p115_p1 = scmp.lt.u32.totalorder %s111_s11, %s175_s0 }
   0x4   :  { %p117_p2 = pnand %p115_p1, %p112_p0 }
   0x6   :  { %120 = shalt.err (!%p117_p2)  }
   0x7   :  { %s127_s16 = smov [#allocation4]  }
   0x8   :  { %8 = dma.hbm_to_smem %s175_s0, 16, %s127_s16, [#allocation3] }
   0x9   :  { %121 = dma.done.wait [#allocation3], 16 }
   0xa   :  { %122 = vsyncadd [#allocation3], 4294967280 }
   0xb   :  { %10 = sfence }
   0xc   :  { %s11_s19 = sld [smem:[#allocation4]]  ;;  %s128_s20 = smov 128  }
   0xd   :  { %30 = sst [smem:[#allocation6]] %s128_s20  ;;  %s129_s21 = smov 32  }
   0xe   :  { %32 = sst [smem:[#allocation6 + $0x1]] %s129_s21  ;;  %s130_s22 = smov 1  }
   0xf   :  { %34 = sst [smem:[#allocation6 + $0x2]] %s130_s22  ;;  %s131_s0 = smov [#allocation2]  }
  0x10   :  { %s132_s3 = smov [#allocation5]   ;;  %s133_s4 = smov 0  }
  0x11   :  { %s44_s10 = scalar_lea.hbm %s177_s2, 16 }
  0x12   :  { %s12_s23 = sshrl.u32 %s11_s19, 3  ;;  %s13_s24 = sand.u32 7, %s11_s19  }
  0x13   :  { %s95_s25 = sshll.u32 %s12_s23, 4  ;;  %s134_s19 = smov [#allocation2 + $0x1]  }
  0x14   :  { %s15_s26 = sadd.s32 %s95_s25, %s13_s24  ;;  %s135_s23 = smov [#allocation7]  }
  0x15   :  { %s96_s27 = sshll.u32 %s15_s26, 4 }
  0x16   :  { %s17_s30 = scalar_lea.hbm %s176_s1, %s96_s27 }
  0x17   :  { %36 = dma.general %s17_s30, 256, %s177_s2, %s131_s0, %s132_s3, [#allocation6], %s133_s4, 0  }
  0x18   :  { %s97_s7 = sld [smem:[#allocation4 + $0x1]]  ;;  %58 = sst [smem:[#allocation8]] %s128_s20 }
  0x19   :  { %60 = sst [smem:[#allocation8 + $0x1]] %s129_s21 }
  0x1a   :  { %62 = sst [smem:[#allocation8 + $0x2]] %s130_s22 }
  0x1e   :  { %s38_s11 = sshrl.u32 %s97_s7, 3  ;;  %s39_s12 = sand.u32 7, %s97_s7  }
  0x1f   :  { %s98_s13 = sshll.u32 %s38_s11, 4 }
  0x20   :  { %s41_s14 = sadd.s32 %s98_s13, %s39_s12 }
  0x21   :  { %s99_s15 = sshll.u32 %s41_s14, 4 }
  0x22   :  { %s43_s18 = scalar_lea.hbm %s176_s1, %s99_s15 }
  0x23   :  { %64 = dma.general %s43_s18, 256, %s44_s10, %s134_s19, %s135_s23, [#allocation8], %s133_s4, 0  }
  0x24   :  { %123 = dma.done.wait [#allocation2], 256 }
  0x25   :  { %124 = vsyncadd [#allocation2], 4294967040 }
  0x26   :  { %125 = dma.done.wait [#allocation2 + $0x1], 256 }
  0x27   :  { %126 = vsyncadd [#allocation2 + $0x1], 4294967040 }
  0x28   :  { %74 = vsyncmov [#allocation2] }
  0x2b   :  { %s75_s20 = vpop.sfrf %74 }
  0x2c   :  { %p100_p3 = scmp.ne.s32.totalorder %s75_s20, 0 }
  0x2e   :  { %79 = shalt.err (%p100_p3)  }
  0x2f   :  { %81 = vsyncmov [#allocation2 + $0x1] }
  0x32   :  { %s82_s2 = vpop.sfrf %81 }
  0x33   :  { %p101_p4 = scmp.ne.s32.totalorder %s82_s2, 0 }
  0x35   :  { %86 = shalt.err (%p101_p4)  }

</bundles_post_ra>
